<compile_context>
chip_gen: v5e
topology: v5e:2x2
jax: 0.10.0
libtpu: 0.0.40
codegen_flags: <defaults>
</compile_context>

<pallas_src>
import functools

import jax
import jax.numpy as jnp
import numpy as np
from jax.experimental import pallas as pl
from jax.experimental.pallas import tpu as pltpu


def _act(name, x):
    if name == "relu":
        return jnp.maximum(x, 0.0)
    if name == "sigmoid":
        return jax.nn.sigmoid(x)
    if name == "elu":
        return jnp.where(x > 0.0, x, jnp.expm1(x))
    raise ValueError(f"unknown act_type {name}")


def _round_up(x, m):
    return ((x + m - 1) // m) * m


# --------------------------------------------------------------------------- #
# Fused kernel
# --------------------------------------------------------------------------- #
def _fused_omega_kernel(*refs, n_layers, act_type):
    # refs = (y, W0_lin, W0_sq, b0, W1, b1, ..., out)
    y_ref = refs[0]
    out_ref = refs[-1]
    wb = refs[1:-1]

    y = y_ref[...]                               # [TILE_N, k] f32

    # Layer 0 folded onto the MXU (no per-net lane slicing / broadcasting):
    #   complex pair j : radius = y[:,2j]^2 + y[:,2j+1]^2 -> rows 2j, 2j+1 of W0_sq
    #   real j         : y[:, 2*ncp + j]                  -> row 2*ncp+j of W0_lin
    w0_lin = wb[0][...]                          # [k, H0]
    w0_sq = wb[1][...]                           # [k, H0]
    b0 = wb[2][...]                              # [1, H0]
    h = (
        jnp.dot(y, w0_lin, preferred_element_type=jnp.float32)
        + jnp.dot(y * y, w0_sq, preferred_element_type=jnp.float32)
        + b0
    )
    h = _act(act_type, h)

    # Remaining layers: ONE block-diagonal matmul per layer covering all nets.
    for l in range(1, n_layers):
        w = wb[2 * l + 1][...]
        b = wb[2 * l + 2][...]
        h = jnp.dot(h, w, preferred_element_type=jnp.float32) + b
        h = _act(act_type, h)

    # Outer activation of nn.Sequential(decoder, act).  relu∘relu is a no-op.
    if act_type != "relu":
        h = _act(act_type, h)

    out_ref[...] = h.astype(out_ref.dtype)


# --------------------------------------------------------------------------- #
# Parameter construction / packing
# --------------------------------------------------------------------------- #
def init_decoder_params(key, widths, scale=0.1):
    """Truncated-normal weights (like weight_initialize 'tn'), small random biases."""
    weights, biases = [], []
    for i in range(len(widths) - 1):
        key, kw, kb = jax.random.split(key, 3)
        w = (
            jax.random.truncated_normal(
                kw, -2.0, 2.0, (widths[i], widths[i + 1]), jnp.float32
            )
            * scale
        )
        b = jax.random.normal(kb, (widths[i + 1],), jnp.float32) * scale
        weights.append(w)
        biases.append(b)
    return weights, biases, key


def pack_omega_params(nets, widths_list, num_complex_pairs, num_real):
    """Stack per-net decoder params into fused layers for the single kernel.

    nets        -- list of (weights, biases) per net, complex nets first.
    widths_list -- per-net width lists; all nets must have the same depth.
    Returns (packed_layers, out_slices):
        packed_layers[0]   = (W0_lin, W0_sq, b0)   layer-0 fold onto ycoords / ycoords^2
        packed_layers[l>0] = (W_l, b_l)            block-diagonal fused layer
        out_slices[i]      = (offset, width) of net i in the fused output slab.
    The final layer is NOT lane-padded: the stored output width equals the sum
    of the per-net output widths.
    """
    num_nets = len(nets)
    assert num_nets == num_complex_pairs + num_real
    depth = len(widths_list[0])
    for w in widths_list:
        assert len(w) == depth, "all omega sub-nets must have the same depth"
        assert w[0] == 1, "omega sub-nets take a single scalar input"
    n_layers = depth - 1
    k = 2 * num_complex_pairs + num_real

    packed = []
    out_slices = None
    for l in range(n_layers):
        ins = [widths_list[i][l] for i in range(num_nets)]
        outs = [widths_list[i][l + 1] for i in range(num_nets)]
        in_offs = np.concatenate([[0], np.cumsum(ins)])[:-1]
        out_offs = np.concatenate([[0], np.cumsum(outs)])[:-1]
        out_sum = int(sum(outs))

        B = np.zeros((1, out_sum), np.float32)
        if l == 0:
            # W0_sq duplicates each complex pair's layer-0 row onto both pair
            # columns (y0^2*w + y1^2*w == radius*w); W0_lin carries real nets.
            W_lin = np.zeros((k, out_sum), np.float32)
            W_sq = np.zeros((k, out_sum), np.float32)
            for i, (ws, bs) in enumerate(nets):
                row = np.asarray(ws[0]).reshape(-1)
                o0 = int(out_offs[i])
                o1 = o0 + int(outs[i])
                if i < num_complex_pairs:
                    W_sq[2 * i, o0:o1] = row
                    W_sq[2 * i + 1, o0:o1] = row
                else:
                    W_lin[2 * num_complex_pairs + (i - num_complex_pairs), o0:o1] = row
                B[0, o0:o1] = np.asarray(bs[0]).reshape(-1)
            packed.append((jnp.asarray(W_lin), jnp.asarray(W_sq), jnp.asarray(B)))
        else:
            W = np.zeros((int(sum(ins)), out_sum), np.float32)
            for i, (ws, bs) in enumerate(nets):
                W[
                    in_offs[i] : in_offs[i] + ins[i],
                    out_offs[i] : out_offs[i] + outs[i],
                ] = np.asarray(ws[l])
                B[0, out_offs[i] : out_offs[i] + outs[i]] = np.asarray(bs[l]).reshape(-1)
            packed.append((jnp.asarray(W), jnp.asarray(B)))
        if l == n_layers - 1:
            out_slices = [(int(out_offs[i]), int(outs[i])) for i in range(num_nets)]
    return packed, out_slices


# --------------------------------------------------------------------------- #
# Forward wrapper (single pallas_call, batch-tiled "parallel" grid)
# --------------------------------------------------------------------------- #
_MIN_MEGACORE_TILE = 512  # rows; >=512-row tiles reach ~85% of HBM roofline


def omega_net_forward(ycoords, params, packed_layers, out_slices, block_n=2048):
    n, k = ycoords.shape
    ncp = params["num_complex_pairs"]
    num_real = params["num_real"]
    assert k == 2 * ncp + num_real
    n_layers = len(packed_layers)
    out_w = packed_layers[-1][0].shape[1]  # real total output width (no lane pad)

    # Row tile: multiple of 8, capped by the (8-aligned) batch.  Large default
    # amortizes the ~0.35 us per-grid-step overhead; per-tile VMEM stays small
    # because the stored output is only `out_w` lanes wide.
    block_n = max(8, _round_up(min(block_n, _round_up(n, 8)), 8))
    n8 = _round_up(n, 8)
    steps = pl.cdiv(n8, block_n)
    if n8 >= 2 * _MIN_MEGACORE_TILE:
        # Megacore (v7x: 2 TCs): at least 2 evenly sized tiles so both cores
        # get work, and spread rows so the last tile isn't mostly padding.
        steps = max(steps, 2)
        if steps % 2:
            steps += 1
        block_n = max(8, _round_up(pl.cdiv(n8, steps), 8))
    n_pad = _round_up(n, block_n)
    y = ycoords if n_pad == n else jnp.pad(ycoords, ((0, n_pad - n), (0, 0)))

    kernel = functools.partial(
        _fused_omega_kernel, n_layers=n_layers, act_type=params["act_type"]
    )

    args = [y]
    in_specs = [pl.BlockSpec((block_n, k), lambda i: (i, 0))]
    for layer in packed_layers:
        for arr in layer:
            args.append(arr)
            in_specs.append(pl.BlockSpec(arr.shape, lambda i: (0, 0)))

    out_all = pl.pallas_call(
        kernel,
        out_shape=jax.ShapeDtypeStruct((n_pad, out_w), jnp.float32),
        grid_spec=pltpu.PrefetchScalarGridSpec(
            num_scalar_prefetch=0,
            grid=(n_pad // block_n,),
            in_specs=in_specs,
            out_specs=pl.BlockSpec((block_n, out_w), lambda i: (i, 0)),
        ),
        compiler_params=pltpu.CompilerParams(dimension_semantics=("parallel",)),
    )(*args)

    out_all = out_all[:n]
    return [out_all[:, off : off + w] for (off, w) in out_slices]


# --------------------------------------------------------------------------- #
# Pure-JAX reference (identical semantics, unfused per-net params)
# --------------------------------------------------------------------------- #
def omega_net_forward_ref(ycoords, params, complex_nets, real_nets):
    def mlp(h, weights, biases, act_type):
        for w, b in zip(weights, biases):
            h = h @ w + b[None, :]
            h = _act(act_type, h)
        return _act(act_type, h)

    omegas = []
    ncp = params["num_complex_pairs"]
    for j in range(ncp):
        pair = ycoords[:, 2 * j : 2 * j + 2]
        r = jnp.sum(pair * pair, axis=1, keepdims=True)
        w, b = complex_nets[j]
        omegas.append(mlp(r, w, b, params["act_type"]))
    for j in range(params["num_real"]):
        col = ycoords[:, 2 * ncp + j][:, None]
        w, b = real_nets[j]
        omegas.append(mlp(col, w, b, params["act_type"]))
    return omegas


if __name__ == "__main__":
    params = {
        "num_complex_pairs": 2,
        "num_real": 1,
        "widths_omega_complex": [1, 32, 2],  # radius -> hidden -> (mu, omega)
        "widths_omega_real": [1, 32, 1],     # coord  -> hidden -> eigenvalue
        "act_type": "relu",
        "scale_omega": 0.1,
    }

    key = jax.random.PRNGKey(0)

    # Per-net parameters (kept unfused for the reference), then fused packing.
    complex_nets, real_nets = [], []
    for _ in range(params["num_complex_pairs"]):
        w, b, key = init_decoder_params(
            key, params["widths_omega_complex"], params["scale_omega"]
        )
        complex_nets.append((w, b))
    for _ in range(params["num_real"]):
        w, b, key = init_decoder_params(
            key, params["widths_omega_real"], params["scale_omega"]
        )
        real_nets.append((w, b))

    widths_list = (
        [params["widths_omega_complex"]] * params["num_complex_pairs"]
        + [params["widths_omega_real"]] * params["num_real"]
    )
    packed_layers, out_slices = pack_omega_params(
        complex_nets + real_nets,
        widths_list,
        params["num_complex_pairs"],
        params["num_real"],
    )

    k = 2 * params["num_complex_pairs"] + params["num_real"]

    def check(y, p, block_n=2048):
        omegas = omega_net_forward(y, p, packed_layers, out_slices, block_n=block_n)
        omegas = [jax.block_until_ready(o) for o in omegas]
        omegas_ref = omega_net_forward_ref(y, p, complex_nets, real_nets)
        for o, o_ref in zip(omegas, omegas_ref):
            assert o.shape == o_ref.shape, (o.shape, o_ref.shape)
            np.testing.assert_allclose(
                np.asarray(o), np.asarray(o_ref), rtol=1e-5, atol=1e-5
            )

    # Case 1: tiny batch, single tile.
    key, kx = jax.random.split(key)
    y_small = jax.random.normal(kx, (8, k), jnp.float32)
    check(y_small, params)

    # Case 2: non-multiple batch with an explicit small tile (exercises row
    # padding + a multi-step parallel grid).
    key, kx = jax.random.split(key)
    y_mid = jax.random.normal(kx, (200, k), jnp.float32)
    check(y_mid, params, block_n=64)

    # Case 3: larger batch with the default tile (exercises the even 2-tile
    # megacore split and the lane-narrow output writeback).
    key, kx = jax.random.split(key)
    y_big = jax.random.normal(kx, (2600, k), jnp.float32)
    check(y_big, params)

    # Case 4: non-relu activations (extra outer activation is not folded).
    for act in ("sigmoid", "elu"):
        check(y_small, dict(params, act_type=act))

    print("KERNEL_OK")
</pallas_src>

<mosaic_0001>
module attributes {stable_mosaic.version = 11 : i64} {
  func.func @_fused_omega_kernel(%arg0: i32, %arg1: memref<8x5xf32, #tpu.memory_space<vmem>>, %arg2: memref<5x96xf32, #tpu.memory_space<vmem>>, %arg3: memref<5x96xf32, #tpu.memory_space<vmem>>, %arg4: memref<1x96xf32, #tpu.memory_space<vmem>>, %arg5: memref<96x5xf32, #tpu.memory_space<vmem>>, %arg6: memref<1x5xf32, #tpu.memory_space<vmem>>, %arg7: memref<8x5xf32, #tpu.memory_space<vmem>>) attributes {dimension_semantics = [#tpu.dimension_semantics<parallel>], iteration_bounds = array<i64: 1>, scalar_prefetch = 0 : i64, scratch_operands = 0 : i64, tpu.core_type = #tpu.core_type<tc>, window_params = [{transform_indices = @transform_0, window_bounds = array<i64: 8, 5>}, {pipeline_mode = #tpu.pipeline_mode<synchronous>, transform_indices = @transform_1, window_bounds = array<i64: 5, 96>}, {pipeline_mode = #tpu.pipeline_mode<synchronous>, transform_indices = @transform_2, window_bounds = array<i64: 5, 96>}, {pipeline_mode = #tpu.pipeline_mode<synchronous>, transform_indices = @transform_3, window_bounds = array<i64: 1, 96>}, {pipeline_mode = #tpu.pipeline_mode<synchronous>, transform_indices = @transform_4, window_bounds = array<i64: 96, 5>}, {pipeline_mode = #tpu.pipeline_mode<synchronous>, transform_indices = @transform_5, window_bounds = array<i64: 1, 5>}, {transform_indices = @transform_6, window_bounds = array<i64: 8, 5>}]} {
    %c0 = arith.constant 0 : index
    %c0_0 = arith.constant 0 : index
    %0 = vector.load %arg1[%c0, %c0_0] : memref<8x5xf32, #tpu.memory_space<vmem>>, vector<8x5xf32>
    %c0_1 = arith.constant 0 : index
    %c0_2 = arith.constant 0 : index
    %1 = vector.load %arg2[%c0_1, %c0_2] : memref<5x96xf32, #tpu.memory_space<vmem>>, vector<5x96xf32>
    %c0_3 = arith.constant 0 : index
    %c0_4 = arith.constant 0 : index
    %2 = vector.load %arg3[%c0_3, %c0_4] : memref<5x96xf32, #tpu.memory_space<vmem>>, vector<5x96xf32>
    %c0_5 = arith.constant 0 : index
    %c0_6 = arith.constant 0 : index
    %3 = vector.load %arg4[%c0_5, %c0_6] : memref<1x96xf32, #tpu.memory_space<vmem>>, vector<1x96xf32>
    %cst = arith.constant dense<0.000000e+00> : vector<8x96xf32>
    %4 = tpu.matmul %0, %1, %cst {dimension_numbers = #tpu.dot_dimension_numbers<[1], [0], [0], [1], [0, 0, 1, 1], [], []>} : vector<8x5xf32>, vector<5x96xf32>, vector<8x96xf32> -> vector<8x96xf32>
    %5 = arith.mulf %0, %0 : vector<8x5xf32>
    %cst_7 = arith.constant dense<0.000000e+00> : vector<8x96xf32>
    %6 = tpu.matmul %5, %2, %cst_7 {dimension_numbers = #tpu.dot_dimension_numbers<[1], [0], [0], [1], [0, 0, 1, 1], [], []>} : vector<8x5xf32>, vector<5x96xf32>, vector<8x96xf32> -> vector<8x96xf32>
    %7 = arith.addf %4, %6 : vector<8x96xf32>
    %8 = vector.broadcast %3 : vector<1x96xf32> to vector<8x96xf32>
    %9 = arith.addf %7, %8 : vector<8x96xf32>
    %cst_8 = arith.constant 0.000000e+00 : f32
    %10 = vector.broadcast %cst_8 : f32 to vector<8x96xf32>
    %11 = arith.maximumf %9, %10 : vector<8x96xf32>
    %c0_9 = arith.constant 0 : index
    %c0_10 = arith.constant 0 : index
    %12 = vector.load %arg5[%c0_9, %c0_10] : memref<96x5xf32, #tpu.memory_space<vmem>>, vector<96x5xf32>
    %c0_11 = arith.constant 0 : index
    %c0_12 = arith.constant 0 : index
    %13 = vector.load %arg6[%c0_11, %c0_12] : memref<1x5xf32, #tpu.memory_space<vmem>>, vector<1x5xf32>
    %cst_13 = arith.constant dense<0.000000e+00> : vector<8x5xf32>
    %14 = tpu.matmul %11, %12, %cst_13 {dimension_numbers = #tpu.dot_dimension_numbers<[1], [0], [0], [1], [0, 0, 1, 1], [], []>} : vector<8x96xf32>, vector<96x5xf32>, vector<8x5xf32> -> vector<8x5xf32>
    %15 = vector.broadcast %13 : vector<1x5xf32> to vector<8x5xf32>
    %16 = arith.addf %14, %15 : vector<8x5xf32>
    %cst_14 = arith.constant 0.000000e+00 : f32
    %17 = vector.broadcast %cst_14 : f32 to vector<8x5xf32>
    %18 = arith.maximumf %16, %17 : vector<8x5xf32>
    %c0_15 = arith.constant 0 : index
    %c0_16 = arith.constant 0 : index
    %19 = vector.load %arg7[%c0_15, %c0_16] : memref<8x5xf32, #tpu.memory_space<vmem>>, vector<8x5xf32>
    tpu.vector_store %arg7[%c0_15, %c0_16], %18 {strides = array<i32>} : memref<8x5xf32, #tpu.memory_space<vmem>>, vector<8x5xf32>,
    return
  }
  func.func @transform_0(%arg0: i32) -> (i32, i32) {
    %c0_i32 = arith.constant 0 : i32
    %c0_i32_0 = arith.constant 0 : i32
    return %arg0, %c0_i32 : i32, i32
  }
  func.func @transform_1(%arg0: i32) -> (i32, i32) {
    %c0_i32 = arith.constant 0 : i32
    %c0_i32_0 = arith.constant 0 : i32
    %c0_i32_1 = arith.constant 0 : i32
    return %c0_i32, %c0_i32_0 : i32, i32
  }
  func.func @transform_2(%arg0: i32) -> (i32, i32) {
    %c0_i32 = arith.constant 0 : i32
    %c0_i32_0 = arith.constant 0 : i32
    %c0_i32_1 = arith.constant 0 : i32
    return %c0_i32, %c0_i32_0 : i32, i32
  }
  func.func @transform_3(%arg0: i32) -> (i32, i32) {
    %c0_i32 = arith.constant 0 : i32
    %c0_i32_0 = arith.constant 0 : i32
    %c0_i32_1 = arith.constant 0 : i32
    return %c0_i32, %c0_i32_0 : i32, i32
  }
  func.func @transform_4(%arg0: i32) -> (i32, i32) {
    %c0_i32 = arith.constant 0 : i32
    %c0_i32_0 = arith.constant 0 : i32
    %c0_i32_1 = arith.constant 0 : i32
    return %c0_i32, %c0_i32_0 : i32, i32
  }
  func.func @transform_5(%arg0: i32) -> (i32, i32) {
    %c0_i32 = arith.constant 0 : i32
    %c0_i32_0 = arith.constant 0 : i32
    %c0_i32_1 = arith.constant 0 : i32
    return %c0_i32, %c0_i32_0 : i32, i32
  }
  func.func @transform_6(%arg0: i32) -> (i32, i32) {
    %c0_i32 = arith.constant 0 : i32
    %c0_i32_0 = arith.constant 0 : i32
    return %arg0, %c0_i32 : i32, i32
  }
}

</mosaic_0001>

<bundles_post_ra>
// kernel: tpu_custom_call.1
= control target key start
LH: loop header
LB: loop body
LE: loop exit
PB: predicated region body
PF: predicated region fallthrough
CT: control target
= control target key end

     0   :  { %vm33_vm0 = vcmask 1044480   ;;  %vm29_vm1 = vcmask 39936   ;;  %s273_s0 = inlined_call_operand.vmem [shape: f32[8,5], index: 0, kind: input, shape index: {}]   ;;  %s274_s1 = inlined_call_operand.vmem [shape: f32[5,96], index: 1, kind: input, shape index: {}]   ;;  %s275_s2 = inlined_call_operand.vmem [shape: f32[5,96], index: 2, kind: input, shape index: {}]   ;;  %s276_s3 = inlined_call_operand.vmem [shape: f32[1,96], index: 3, kind: input, shape index: {}]   ;;  %s277_s4 = inlined_call_operand.vmem [shape: f32[96,5], index: 4, kind: input, shape index: {}]   ;;  %s278_s5 = inlined_call_operand.vmem [shape: f32[1,5], index: 5, kind: input, shape index: {}]   ;;  %s279_s6 = inlined_call_operand.hbm [shape: f32[8,5], index: 6, kind: output, shape index: {}]  }
   0x1   :  { %v26_v0 = vld [vmem:[%s275_s2] sm:$0x1f]  ;;  %v99_v4 = vld [vmem:[%s277_s4 + $0x58] sm:$0xff]  ;;  %v98_v5 = vld [vmem:[%s277_s4 + $0x50] sm:$0xff] }
   0x2   :  { %v25_v1 = vld [vmem:[%s274_s1] sm:$0x1f]  ;;  %146 = vmatpush.msk.msra.mxu0 %vm33_vm0, %v26_v0  ;;  %112 = vmatpush.msra.mxu2 %v99_v4  ;;  %v97_v6 = vld [vmem:[%s277_s4 + $0x48] sm:$0xff] }
   0x3   :  { %v24_v2 = vld [vmem:[%s273_s0] sm:$0xff]  ;;  %148 = vmatpush.msk.msra.mxu1 %vm33_vm0, %v25_v1 }
   0x4   :  { %v28_v3 = vmul.f32 %v24_v2, %v24_v2  ;;  %149 = vmatmul.msk.f32.vlgmr.msra.gmra.mxu1 %vm29_vm1, %v24_v2  ;;  %113 = vmatpush.msra.mxu2 %v98_v5 }
   0x6   :  { %147 = vmatmul.msk.f32.vlgmr.msra.gmra.mxu0 %vm29_vm1, %v28_v3 }
   0x7   :  { %11 = vsyncpa [#allocation3], 0  ;;  %v96_v7 = vld [vmem:[%s277_s4 + $0x40] sm:$0xff]  ;;  %114 = vmatpush.msra.mxu2 %v97_v6  ;;  %v95_v8 = vld [vmem:[%s277_s4 + $0x38] sm:$0xff]  ;;  %vm104_vm2 = vcmask 785408   ;;  %s180_s28 = smov [#allocation2]  }
   0x8   :  { %v94_v9 = vld [vmem:[%s277_s4 + $0x30] sm:$0xff]  ;;  %v93_v10 = vld [vmem:[%s277_s4 + $0x28] sm:$0xff]  ;;  %v92_v11 = vld [vmem:[%s277_s4 + $0x20] sm:$0xff]  ;;  %s135_s29 = sshll.u32 %s180_s28, 4  ;;  %s137_s1 = sshll.u32 %s279_s6, 4  ;;  %s136_s29 = int_to_ptr.vmem [resolvable:$true] %s135_s29  ;;  %s138_s1 = int_to_ptr.hbm [resolvable:$true] %s137_s1 }
   0x9   :  { %115 = vmatpush.msra.mxu2 %v96_v7  ;;  %v91_v12 = vld [vmem:[%s277_s4 + $0x18] sm:$0xff]  ;;  %v90_v13 = vld [vmem:[%s277_s4 + $0x10] sm:$0xff]  ;;  %v89_v14 = vld [vmem:[%s277_s4 + $0x8] sm:$0xff] }
   0xa   :  { %v88_v15 = vld [vmem:[%s277_s4] sm:$0xff] }
   0xb   :  { %116 = vmatpush.msra.mxu2 %v95_v8  ;;  %v152_v17 = vld [vmem:[%s276_s3] ss:$0 sm:$0xff] }
   0xc   :  { %v153_v22 = vld [vmem:[%s278_s5] ss:$0 sm:$0xff] }
   0xd   :  { %117 = vmatpush.msra.mxu2 %v94_v9 }
   0xf   :  { %118 = vmatpush.msra.mxu2 %v93_v10 }
  0x11   :  { %119 = vmatpush.msra.mxu2 %v92_v11 }
  0x13   :  { %120 = vmatpush.msra.mxu2 %v91_v12 }
  0x15   :  { %121 = vmatpush.msra.mxu2 %v90_v13 }
  0x17   :  { %122 = vmatpush.msra.mxu2 %v89_v14 }
  0x19   :  { %123 = vmatpush.msra.mxu2 %v88_v15 }
  0x81   :  { %v80_v16 = vpop.f32.mrf.mxu1 }
  0x83   :  { %v54_v18 = vpop.f32.mrf.mxu0 }
  0x84   :  { %v81_v19 = vadd.f32 %v80_v16, %v54_v18 }
  0x86   :  { %v86_v20 = vadd.f32 %v152_v17, %v81_v19 }
  0x88   :  { %v87_v21 = vmax.f32 %v86_v20, 0.0 }
  0x8a   :  { %150 = vmatmul.msk.f32.vlgmr.msra.gmra.mxu2 %vm104_vm2, %v87_v21 }
 0x10d   :  { %v125_v23 = vpop.f32.mrf.mxu2 }
 0x10e   :  { %v126_v24 = vadd.f32 %v153_v22, %v125_v23 }
 0x110   :  { %v128_v25 = vmax.f32 %v126_v24, 0.0 }
 0x112   :  { %129 = vst.msk [vmem:[#allocation2] sm:$0xff] %vm29_vm1, %v128_v25 }
 0x113   :  { %140 = dma.vmem_to_hbm [thread:$0]  %s136_s29, 128, %s138_s1, [#allocation3]  }
 0x114   :  { %178 = dma.done.wait [#allocation3], 128  }
 0x115   :  { %179 = vsyncadd [#allocation3], 4294967168 }
 0x116   :  { %145 = vsyncpa [#allocation3], 1 }

</bundles_post_ra>
